<compile_context>
chip_gen: v7x
topology: tpu7x:2x2x1
jax: 0.10.0
libtpu: 0.0.40
codegen_flags: <defaults>
</compile_context>

<pallas_src>
import functools
import math

import jax
import jax.numpy as jnp
from jax import lax
from jax.experimental import pallas as pl
from jax.experimental.pallas import tpu as pltpu

LANES = 128                       # lane width
CHUNK_ROWS = 64                   # (64, 128) f32 chunk = 8 vregs = 32 KiB
CHUNK_ELEMS = CHUNK_ROWS * LANES  # 8192 elements per chunk
MAX_CHUNKS_PER_BLOCK = 64         # 64 * 32 KiB = 2 MiB per input block


# ---------------------------------------------------------------------------
# Kernel: accumulate sum(noise * param) into a lane-dense (64, 128) partial.
# ---------------------------------------------------------------------------
def _make_noise_dot_kernel(chunks_per_block):
    unroll = 2 if chunks_per_block >= 2 else 1

    def kernel(noise_ref, param_ref, acc_ref):
        # noise_ref / param_ref: (chunks_per_block, CHUNK_ROWS, LANES) blocks.
        # acc_ref:               (1, CHUNK_ROWS, LANES) resident partial sums
        #                        (same output block across the reduction axis).
        @pl.when(pl.program_id(1) == 0)
        def _():
            acc_ref[...] = jnp.zeros_like(acc_ref)

        def body(c, acc):
            # One chunk = 8 vregs per operand: 16 vld + 8 vmul + 8 vadd.
            # Nothing larger than a chunk is ever live -> no vreg spills.
            return acc + noise_ref[c] * param_ref[c]

        acc_ref[0] = lax.fori_loop(0, chunks_per_block, body, acc_ref[0],
                                   unroll=unroll)

    return kernel


# ---------------------------------------------------------------------------
# Layout helpers (all static Python ints at trace time).
# ---------------------------------------------------------------------------
def _num_tensorcores():
    """One shard per TensorCore: 2 on v7x, 1 on v5e / v6e (and non-TPU)."""
    try:
        dev = jax.devices()[0]
        if dev.platform != "tpu":
            return 1
        return 2 if "v7" in dev.device_kind.lower() else 1
    except Exception:
        return 1


def _slab_layout(n_elems):
    """Return (chunks_per_block, blocks_per_shard, num_shards, total_chunks)."""
    chunks = max(1, -(-n_elems // CHUNK_ELEMS))
    chunks_per_block = min(MAX_CHUNKS_PER_BLOCK, chunks)
    blocks = -(-chunks // chunks_per_block)
    num_shards = max(1, min(_num_tensorcores(), blocks))
    blocks = -(-blocks // num_shards) * num_shards
    total_chunks = blocks * chunks_per_block
    return chunks_per_block, blocks // num_shards, num_shards, total_chunks


def _flatten_concat_pad(params, total_elems):
    """Flatten+concat f32 params, zero-pad, reshape (chunks, 64, 128)."""
    flat = jnp.concatenate([jnp.ravel(p).astype(jnp.float32) for p in params])
    pad = total_elems - flat.shape[0]
    if pad:
        flat = jnp.concatenate([flat, jnp.zeros((pad,), jnp.float32)])
    return flat.reshape(-1, CHUNK_ROWS, LANES)


# ---------------------------------------------------------------------------
# Public entry point (NoiseLoss.forward equivalent).
# ---------------------------------------------------------------------------
@functools.partial(jax.jit, static_argnames=("return_noise",))
def noise_loss(params, noise_key, scale, observed, return_noise=False):
    """JAX/Pallas equivalent of NoiseLoss.forward.

    params:    list of f32 arrays (module parameters, arbitrary shapes)
    noise_key: jax PRNG key for the N(0, 1) noise (torch: noise.normal_(0, 1))
    scale, observed: scalars
    return_noise: also return the noise slab (debug / verification).
    """
    assert scale is not None, "Please provide scale"

    n_elems = sum(math.prod(p.shape) for p in params)
    chunks_per_block, blocks_per_shard, num_shards, total_chunks = (
        _slab_layout(n_elems))

    param_slab = _flatten_concat_pad(params, total_chunks * CHUNK_ELEMS)
    # Padded tail elements of param_slab are zero, so the extra noise there
    # contributes nothing to the dot product.
    noise_slab = jax.random.normal(noise_key, param_slab.shape, jnp.float32)

    slab_spec = pl.BlockSpec(
        (chunks_per_block, CHUNK_ROWS, LANES),
        lambda s, i: (s * blocks_per_shard + i, 0, 0))

    partials = pl.pallas_call(
        _make_noise_dot_kernel(chunks_per_block),
        out_shape=jax.ShapeDtypeStruct((num_shards, CHUNK_ROWS, LANES),
                                       jnp.float32),
        grid_spec=pltpu.PrefetchScalarGridSpec(
            num_scalar_prefetch=0,
            grid=(num_shards, blocks_per_shard),
            in_specs=[slab_spec, slab_spec],
            out_specs=pl.BlockSpec((1, CHUNK_ROWS, LANES),
                                   lambda s, i: (s, 0, 0)),
        ),
        compiler_params=pltpu.CompilerParams(
            dimension_semantics=("parallel", "arbitrary"),
        ),
    )(noise_slab, param_slab)

    # The only cross-lane reduction: one small (num_shards, 64, 128) fold.
    loss = (scale * jnp.sum(partials)) / observed
    if return_noise:
        return loss, noise_slab
    return loss


if __name__ == "__main__":
    key = jax.random.PRNGKey(0)
    k1, k2, k3, k4, knoise = jax.random.split(key, 5)

    # Small deterministic "model parameters": a 2-layer MLP (hidden=32) -- the
    # kind of parameter list NoiseLoss.__init__ receives.
    params = [
        jax.random.normal(k1, (32, 16), jnp.float32) * 0.1,  # fc1 weight
        jax.random.normal(k2, (32,), jnp.float32) * 0.1,     # fc1 bias
        jax.random.normal(k3, (8, 32), jnp.float32) * 0.1,   # fc2 weight
        jax.random.normal(k4, (8,), jnp.float32) * 0.1,      # fc2 bias
    ]
    scale = 0.5
    observed = 100.0

    # Debug path: also return the noise slab so the loss can be checked
    # exactly against a pure-JAX reference computed from the same noise.
    loss, noise_slab = noise_loss(params, knoise, scale, observed,
                                  return_noise=True)
    loss, noise_slab = jax.block_until_ready((loss, noise_slab))

    # Production path: identical key -> identical noise -> identical loss.
    loss_fast = jax.block_until_ready(noise_loss(params, knoise, scale,
                                                 observed))

    # Pure-JAX reference using the same noise (padding contributes zero).
    param_slab = _flatten_concat_pad(params, noise_slab.size)
    ref = (scale * jnp.sum(noise_slab * param_slab)) / observed

    assert jnp.allclose(loss, ref, rtol=1e-4, atol=1e-6), (float(loss),
                                                           float(ref))
    assert jnp.allclose(loss_fast, loss, rtol=1e-5, atol=1e-7), (
        float(loss_fast), float(loss))

    # Sanity-check the N(0, 1) noise (8192 samples here).
    n_mean = float(jnp.mean(noise_slab))
    n_std = float(jnp.std(noise_slab))
    assert abs(n_mean) < 0.1 and abs(n_std - 1.0) < 0.1, (n_mean, n_std)

    print("KERNEL_OK")
</pallas_src>

<mosaic_0001>
module attributes {stable_mosaic.version = 11 : i64} {
  func.func @kernel(%arg0: i32, %arg1: i32, %arg2: memref<1x64x128xf32, #tpu.memory_space<vmem>>, %arg3: memref<1x64x128xf32, #tpu.memory_space<vmem>>, %arg4: memref<1x64x128xf32, #tpu.memory_space<vmem>>) attributes {dimension_semantics = [#tpu.dimension_semantics<parallel>, #tpu.dimension_semantics<arbitrary>], iteration_bounds = array<i64: 1, 1>, scalar_prefetch = 0 : i64, scratch_operands = 0 : i64, tpu.core_type = #tpu.core_type<tc>, window_params = [{transform_indices = @transform_0, window_bounds = array<i64: 1, 64, 128>}, {transform_indices = @transform_1, window_bounds = array<i64: 1, 64, 128>}, {transform_indices = @transform_2, window_bounds = array<i64: 1, 64, 128>}]} {
    %c0_i32 = arith.constant 0 : i32
    %0 = arith.cmpi eq, %arg1, %c0_i32 : i32
    %1 = arith.extui %0 : i1 to i32
    %c0_i32_0 = arith.constant 0 : i32
    %2 = arith.cmpi ne, %1, %c0_i32_0 : i32
    scf.if %2 {
      %cst = arith.constant 0.000000e+00 : f32
      %16 = vector.broadcast %cst : f32 to vector<1x64x128xf32>
      %c0_11 = arith.constant 0 : index
      %c0_12 = arith.constant 0 : index
      %c0_13 = arith.constant 0 : index
      %17 = vector.load %arg4[%c0_11, %c0_12, %c0_13] : memref<1x64x128xf32, #tpu.memory_space<vmem>>, vector<1x64x128xf32>
      tpu.vector_store %arg4[%c0_11, %c0_12, %c0_13], %16 {strides = array<i32>} : memref<1x64x128xf32, #tpu.memory_space<vmem>>, vector<1x64x128xf32>,
    } else {
    }
    %c0 = arith.constant 0 : index
    %c0_1 = arith.constant 0 : index
    %c0_2 = arith.constant 0 : index
    %3 = vector.load %arg4[%c0, %c0_1, %c0_2] : memref<1x64x128xf32, #tpu.memory_space<vmem>>, vector<1x64x128xf32>
    %4 = vector.shape_cast %3 : vector<1x64x128xf32> to vector<64x128xf32>
    %c0_i32_3 = arith.constant 0 : i32
    %5 = arith.index_cast %c0_i32_3 : i32 to index
    %c0_4 = arith.constant 0 : index
    %c0_5 = arith.constant 0 : index
    %6 = vector.load %arg2[%5, %c0_4, %c0_5] : memref<1x64x128xf32, #tpu.memory_space<vmem>>, vector<1x64x128xf32>
    %7 = vector.shape_cast %6 : vector<1x64x128xf32> to vector<64x128xf32>
    %8 = arith.index_cast %c0_i32_3 : i32 to index
    %c0_6 = arith.constant 0 : index
    %c0_7 = arith.constant 0 : index
    %9 = vector.load %arg3[%8, %c0_6, %c0_7] : memref<1x64x128xf32, #tpu.memory_space<vmem>>, vector<1x64x128xf32>
    %10 = vector.shape_cast %9 : vector<1x64x128xf32> to vector<64x128xf32>
    %11 = arith.mulf %7, %10 : vector<64x128xf32>
    %12 = arith.addf %4, %11 : vector<64x128xf32>
    %c1_i32 = arith.constant 1 : i32
    %c0_8 = arith.constant 0 : index
    %c0_9 = arith.constant 0 : index
    %c0_10 = arith.constant 0 : index
    %13 = vector.load %arg4[%c0_8, %c0_9, %c0_10] : memref<1x64x128xf32, #tpu.memory_space<vmem>>, vector<1x64x128xf32>
    %14 = vector.shape_cast %13 : vector<1x64x128xf32> to vector<64x128xf32>
    %15 = vector.shape_cast %12 : vector<64x128xf32> to vector<1x64x128xf32>
    tpu.vector_store %arg4[%c0_8, %c0_9, %c0_10], %15 {strides = array<i32>} : memref<1x64x128xf32, #tpu.memory_space<vmem>>, vector<1x64x128xf32>,
    return
  }
  func.func @transform_0(%arg0: i32, %arg1: i32) -> (i32, i32, i32) {
    %c1_i32 = arith.constant 1 : i32
    %0 = arith.muli %arg0, %c1_i32 : i32
    %1 = arith.addi %0, %arg1 : i32
    %c0_i32 = arith.constant 0 : i32
    %c0_i32_0 = arith.constant 0 : i32
    %c0_i32_1 = arith.constant 0 : i32
    return %1, %c0_i32, %c0_i32_0 : i32, i32, i32
  }
  func.func @transform_1(%arg0: i32, %arg1: i32) -> (i32, i32, i32) {
    %c1_i32 = arith.constant 1 : i32
    %0 = arith.muli %arg0, %c1_i32 : i32
    %1 = arith.addi %0, %arg1 : i32
    %c0_i32 = arith.constant 0 : i32
    %c0_i32_0 = arith.constant 0 : i32
    %c0_i32_1 = arith.constant 0 : i32
    return %1, %c0_i32, %c0_i32_0 : i32, i32, i32
  }
  func.func @transform_2(%arg0: i32, %arg1: i32) -> (i32, i32, i32) {
    %c0_i32 = arith.constant 0 : i32
    %c0_i32_0 = arith.constant 0 : i32
    %c0_i32_1 = arith.constant 0 : i32
    return %arg0, %c0_i32, %c0_i32_0 : i32, i32, i32
  }
}

</mosaic_0001>

<bundles_post_ra>
// kernel: noise_loss.1
= control target key start
LH: loop header
LB: loop body
LE: loop exit
PB: predicated region body
PF: predicated region fallthrough
CT: control target
= control target key end

     0   :  { %s215_s0 = inlined_call_operand.vmem [shape: f32[1,64,128], index: 0, kind: input, shape index: {}]   ;;  %s216_s1 = inlined_call_operand.vmem [shape: f32[1,64,128], index: 1, kind: input, shape index: {}]   ;;  %s217_s2 = inlined_call_operand.vmem [shape: f32[1,64,128], index: 2, kind: output, shape index: {}]  }
   0x1   :  { %v71_v0 = vld [vmem:[%s215_s0] sm:$0xff]  ;;  %v72_v2 = vld [vmem:[%s215_s0 + $0x8] sm:$0xff]  ;;  %v73_v5 = vld [vmem:[%s215_s0 + $0x10] sm:$0xff] }
   0x2   :  { %v79_v1 = vld [vmem:[%s216_s1] sm:$0xff]  ;;  %v80_v4 = vld [vmem:[%s216_s1 + $0x8] sm:$0xff]  ;;  %v81_v6 = vld [vmem:[%s216_s1 + $0x10] sm:$0xff] }
   0x3   :  { %v87_v3 = vmul.f32 %v79_v1, %v71_v0  ;;  %v88_v7 = vmul.f32 %v80_v4, %v72_v2  ;;  %v89_v8 = vmul.f32 %v81_v6, %v73_v5  ;;  %v74_v9 = vld [vmem:[%s215_s0 + $0x18] sm:$0xff]  ;;  %v75_v11 = vld [vmem:[%s215_s0 + $0x20] sm:$0xff]  ;;  %v76_v14 = vld [vmem:[%s215_s0 + $0x28] sm:$0xff] }
   0x4   :  { %v82_v10 = vld [vmem:[%s216_s1 + $0x18] sm:$0xff]  ;;  %v83_v13 = vld [vmem:[%s216_s1 + $0x20] sm:$0xff]  ;;  %v84_v15 = vld [vmem:[%s216_s1 + $0x28] sm:$0xff] }
   0x5   :  { %v90_v12 = vmul.f32 %v82_v10, %v74_v9  ;;  %v91_v16 = vmul.f32 %v83_v13, %v75_v11  ;;  %v92_v17 = vmul.f32 %v84_v15, %v76_v14  ;;  %v77_v18 = vld [vmem:[%s215_s0 + $0x30] sm:$0xff]  ;;  %v78_v20 = vld [vmem:[%s215_s0 + $0x38] sm:$0xff]  ;;  %103 = vst [vmem:[%s217_s2] sm:$0xff] %v87_v3  ;;  %104 = vst [vmem:[%s217_s2 + $0x8] sm:$0xff] %v88_v7 }
   0x6   :  { %v85_v19 = vld [vmem:[%s216_s1 + $0x30] sm:$0xff]  ;;  %v86_v22 = vld [vmem:[%s216_s1 + $0x38] sm:$0xff]  ;;  %105 = vst [vmem:[%s217_s2 + $0x10] sm:$0xff] %v89_v8 }
   0x7   :  { %v93_v21 = vmul.f32 %v85_v19, %v77_v18  ;;  %v94_v23 = vmul.f32 %v86_v22, %v78_v20  ;;  %106 = vst [vmem:[%s217_s2 + $0x18] sm:$0xff] %v90_v12  ;;  %107 = vst [vmem:[%s217_s2 + $0x20] sm:$0xff] %v91_v16 }
   0x8   :  { %108 = vst [vmem:[%s217_s2 + $0x28] sm:$0xff] %v92_v17 }
   0x9   :  { %109 = vst [vmem:[%s217_s2 + $0x30] sm:$0xff] %v93_v21  ;;  %110 = vst [vmem:[%s217_s2 + $0x38] sm:$0xff] %v94_v23 }

</bundles_post_ra>
